<compile_context>
chip_gen: v6e
topology: v6e:2x2x1
jax: 0.10.0
libtpu: 0.0.40
codegen_flags: <defaults>
</compile_context>

<pallas_src>
import jax
import jax.numpy as jnp
from jax import lax
from jax.experimental import pallas as pl
from jax.experimental.pallas import tpu as pltpu


# ----------------------------------------------------------------------------
# Kernel bodies
# ----------------------------------------------------------------------------
def _fedrec_kernel(w_ref, items_ref, out_ref):
    # w_ref: (1, D)   items_ref: (TM, D)   out_ref: (1, TM)
    # MXU matvec contracting over D -> lane-dense (1, TM) row, f32 accumulate.
    out_ref[...] = lax.dot_general(
        w_ref[...], items_ref[...],
        dimension_numbers=(((1,), (1,)), ((), ())),
        preferred_element_type=jnp.float32,
    ).astype(out_ref.dtype)


def _fedrec_batched_kernel(w_ref, items_ref, out_ref):
    # w_ref: (Cb, 1, D)   items_ref: (Cb, N, D)   out_ref: (Cb, N)
    # Batched matvec (batch = clients, contract D), f32 accumulate, lane-dense.
    scores = jnp.einsum(
        "cod,cnd->con", w_ref[...], items_ref[...],
        preferred_element_type=jnp.float32)            # (Cb, 1, N)
    out_ref[...] = scores[:, 0, :].astype(out_ref.dtype)


# ----------------------------------------------------------------------------
# Tile sizing helpers
# ----------------------------------------------------------------------------
def _choose_tile_m(n, d, itemsize, *, max_tile=8192,
                   items_budget_bytes=12 * 1024 * 1024):
    """Largest 128-multiple row tile whose double-buffered block fits budget."""
    bytes_per_row = max(1, d * itemsize)
    cap = (items_budget_bytes // (2 * bytes_per_row)) // 128 * 128
    tile_m = max(128, min(max_tile, cap))
    if n <= tile_m:
        return n                      # single full-extent block
    return tile_m                     # multiple of 128; ragged tail via cdiv grid


def _choose_clients_per_block(c, n, d, itemsize, *, target_bytes=2 * 1024 * 1024,
                              items_budget_bytes=12 * 1024 * 1024):
    """Clients per grid step: ~target_bytes of item rows, VMEM-capped."""
    per_client = max(1, n * d * itemsize)
    cb = max(1, min(target_bytes // per_client,
                    items_budget_bytes // (2 * per_client)))
    if cb >= c:
        return c
    if cb < 8:
        # Output block sublane dim must be a multiple of 8 (or == C).
        # TODO(synk): for very large per-client N, fall back to fedrec_forward.
        cb = 8
    else:
        cb = (cb // 8) * 8
    return min(cb, c)


def _vmem_limit(block_bytes):
    # Double-buffered blocks + headroom, clamped to a safe range on all gens.
    needed = 2 * block_bytes + 8 * 1024 * 1024
    return int(min(48 * 1024 * 1024, max(16 * 1024 * 1024, needed)))


# ----------------------------------------------------------------------------
# Per-client forward: user_emb_weight (1, D), items_emb (N, D) -> scores (N,)
# ----------------------------------------------------------------------------
def fedrec_forward(user_emb_weight, items_emb, *, tile_m=None):
    items_emb = jnp.asarray(items_emb)                    # native dtype in HBM
    N, D = items_emb.shape
    w = jnp.asarray(user_emb_weight).reshape(1, D).astype(items_emb.dtype)
    itemsize = items_emb.dtype.itemsize

    if tile_m is None:
        tile_m = _choose_tile_m(N, D, itemsize)
    else:
        tile_m = min(int(tile_m), N)
    assert tile_m == N or tile_m % 128 == 0, \
        "tile_m must be a multiple of 128 (or == N)"

    num_tiles = pl.cdiv(N, tile_m)
    block_bytes = tile_m * D * itemsize + tile_m * 4 + D * itemsize

    out = pl.pallas_call(
        _fedrec_kernel,
        out_shape=jax.ShapeDtypeStruct((1, num_tiles * tile_m), jnp.float32),
        grid_spec=pl.GridSpec(
            grid=(num_tiles,),
            in_specs=[
                pl.BlockSpec((1, D), lambda i: (0, 0)),          # resident user row
                pl.BlockSpec((tile_m, D), lambda i: (i, 0)),     # item row tile
            ],
            out_specs=pl.BlockSpec((1, tile_m), lambda i: (0, i)),  # lane-dense
        ),
        compiler_params=pltpu.CompilerParams(
            dimension_semantics=("parallel",),
            vmem_limit_bytes=_vmem_limit(block_bytes),
        ),
        cost_estimate=pl.CostEstimate(
            flops=2 * N * D, transcendentals=0,
            bytes_accessed=N * D * itemsize + D * itemsize + N * 4),
    )(w, items_emb)

    return out[0, :N]  # (N,)


# ----------------------------------------------------------------------------
# Batched forward over many clients in ONE launch (production path):
#   user_emb_weights (C, 1, D) or (C, D), items_emb (C, N, D) -> scores (C, N)
# ----------------------------------------------------------------------------
def fedrec_forward_batched(user_emb_weights, items_emb, *, clients_per_block=None):
    items_emb = jnp.asarray(items_emb)                    # native dtype in HBM
    C, N, D = items_emb.shape
    w = jnp.asarray(user_emb_weights).reshape(C, 1, D).astype(items_emb.dtype)
    itemsize = items_emb.dtype.itemsize

    if clients_per_block is None:
        cb = _choose_clients_per_block(C, N, D, itemsize)
    else:
        cb = min(int(clients_per_block), C)
    assert cb == C or cb % 8 == 0, \
        "clients_per_block must be a multiple of 8 (or == C)"

    num_blocks = pl.cdiv(C, cb)
    block_bytes = cb * N * D * itemsize + cb * N * 4 + cb * D * itemsize

    out = pl.pallas_call(
        _fedrec_batched_kernel,
        out_shape=jax.ShapeDtypeStruct((C, N), jnp.float32),
        grid_spec=pl.GridSpec(
            grid=(num_blocks,),
            in_specs=[
                pl.BlockSpec((cb, 1, D), lambda c: (c, 0, 0)),   # user rows
                pl.BlockSpec((cb, N, D), lambda c: (c, 0, 0)),   # whole clients
            ],
            out_specs=pl.BlockSpec((cb, N), lambda c: (c, 0)),   # lane-dense
        ),
        compiler_params=pltpu.CompilerParams(
            dimension_semantics=("parallel",),    # shards clients across v7x TCs
            vmem_limit_bytes=_vmem_limit(block_bytes),
        ),
        cost_estimate=pl.CostEstimate(
            flops=2 * C * N * D, transcendentals=0,
            bytes_accessed=C * N * D * itemsize + C * D * itemsize + C * N * 4),
    )(w, items_emb)

    return out  # (C, N)


if __name__ == "__main__":
    key = jax.random.PRNGKey(0)
    k_w, k_items, k_big, k_sw, k_si, k_wb, k_ib = jax.random.split(key, 7)

    dim = 128  # embedding dimension (lane axis)

    # --- per-client forward at module-consistent small shapes ----------------
    n_items = 32
    user_emb_weight = (0.01 * jax.random.normal(k_w, (1, dim))).astype(jnp.float32)
    items_emb = jax.random.normal(k_items, (n_items, dim)).astype(jnp.float32)

    scores = jax.block_until_ready(fedrec_forward(user_emb_weight, items_emb))
    ref = jnp.sum(user_emb_weight * items_emb, axis=-1)
    assert scores.shape == (n_items,)
    assert jnp.allclose(scores, ref, atol=2e-3, rtol=1e-2), "per-client f32 mismatch"

    # --- ragged N with an explicit 128-multiple row tile ----------------------
    n_big = 1000
    items_big = jax.random.normal(k_big, (n_big, dim)).astype(jnp.float32)
    scores_big = jax.block_until_ready(
        fedrec_forward(user_emb_weight, items_big, tile_m=256))
    ref_big = jnp.sum(user_emb_weight * items_big, axis=-1)
    assert scores_big.shape == (n_big,)
    assert jnp.allclose(scores_big, ref_big, atol=2e-3, rtol=1e-2), "ragged-N mismatch"

    # --- bf16 embeddings streamed natively (no f32 copy in HBM) ---------------
    items_bf16 = items_big.astype(jnp.bfloat16)
    scores_bf16 = jax.block_until_ready(
        fedrec_forward(user_emb_weight, items_bf16, tile_m=256))
    ref_bf16 = jnp.sum(user_emb_weight.astype(jnp.bfloat16).astype(jnp.float32)
                       * items_bf16.astype(jnp.float32), axis=-1)
    assert jnp.allclose(scores_bf16, ref_bf16, atol=5e-3, rtol=2e-2), "bf16 mismatch"

    # --- realistic tiny FedRec shape (dim=32, ~20 interactions) ---------------
    w_small = (0.01 * jax.random.normal(k_sw, (1, 32))).astype(jnp.float32)
    items_small = jax.random.normal(k_si, (20, 32)).astype(jnp.float32)
    scores_small = jax.block_until_ready(fedrec_forward(w_small, items_small))
    ref_small = jnp.sum(w_small * items_small, axis=-1)
    assert jnp.allclose(scores_small, ref_small, atol=2e-3, rtol=1e-2), "small-shape mismatch"

    # --- many clients fused into one launch (production path) -----------------
    n_clients, n_per_client = 12, 300
    w_batch = (0.01 * jax.random.normal(k_wb, (n_clients, 1, dim))).astype(jnp.float32)
    items_batch = jax.random.normal(
        k_ib, (n_clients, n_per_client, dim)).astype(jnp.float32)
    ref_batch = jnp.sum(w_batch * items_batch, axis=-1)

    scores_batch = jax.block_until_ready(
        fedrec_forward_batched(w_batch, items_batch))          # auto Cb (= C here)
    assert scores_batch.shape == (n_clients, n_per_client)
    assert jnp.allclose(scores_batch, ref_batch, atol=2e-3, rtol=1e-2), "batched mismatch"

    scores_batch8 = jax.block_until_ready(
        fedrec_forward_batched(w_batch, items_batch, clients_per_block=8))  # ragged C grid
    assert jnp.allclose(scores_batch8, ref_batch, atol=2e-3, rtol=1e-2), "ragged-C mismatch"

    print("KERNEL_OK")
</pallas_src>

<mosaic_0001>
module attributes {stable_mosaic.version = 11 : i64} {
  func.func @_fedrec_kernel(%arg0: i32, %arg1: memref<1x128xf32, #tpu.memory_space<vmem>>, %arg2: memref<32x128xf32, #tpu.memory_space<vmem>>, %arg3: memref<1x32xf32, #tpu.memory_space<vmem>>) attributes {dimension_semantics = [#tpu.dimension_semantics<parallel>], iteration_bounds = array<i64: 1>, scalar_prefetch = 0 : i64, scratch_operands = 0 : i64, tpu.core_type = #tpu.core_type<tc>, window_params = [{pipeline_mode = #tpu.pipeline_mode<synchronous>, transform_indices = @transform_0, window_bounds = array<i64: 1, 128>}, {transform_indices = @transform_1, window_bounds = array<i64: 32, 128>}, {transform_indices = @transform_2, window_bounds = array<i64: 1, 32>}]} {
    %c0 = arith.constant 0 : index
    %c0_0 = arith.constant 0 : index
    %0 = vector.load %arg1[%c0, %c0_0] : memref<1x128xf32, #tpu.memory_space<vmem>>, vector<1x128xf32>
    %c0_1 = arith.constant 0 : index
    %c0_2 = arith.constant 0 : index
    %1 = vector.load %arg2[%c0_1, %c0_2] : memref<32x128xf32, #tpu.memory_space<vmem>>, vector<32x128xf32>
    %cst = arith.constant dense<0.000000e+00> : vector<1x32xf32>
    %2 = tpu.matmul %0, %1, %cst {dimension_numbers = #tpu.dot_dimension_numbers<[1], [1], [0], [0], [0, 0, 1, 0], [], []>} : vector<1x128xf32>, vector<32x128xf32>, vector<1x32xf32> -> vector<1x32xf32>
    %c0_3 = arith.constant 0 : index
    %c0_4 = arith.constant 0 : index
    %3 = vector.load %arg3[%c0_3, %c0_4] : memref<1x32xf32, #tpu.memory_space<vmem>>, vector<1x32xf32>
    tpu.vector_store %arg3[%c0_3, %c0_4], %2 {strides = array<i32>} : memref<1x32xf32, #tpu.memory_space<vmem>>, vector<1x32xf32>,
    return
  }
  func.func @transform_0(%arg0: i32) -> (i32, i32) {
    %c0_i32 = arith.constant 0 : i32
    %c0_i32_0 = arith.constant 0 : i32
    %c0_i32_1 = arith.constant 0 : i32
    return %c0_i32, %c0_i32_0 : i32, i32
  }
  func.func @transform_1(%arg0: i32) -> (i32, i32) {
    %c0_i32 = arith.constant 0 : i32
    %c0_i32_0 = arith.constant 0 : i32
    return %arg0, %c0_i32 : i32, i32
  }
  func.func @transform_2(%arg0: i32) -> (i32, i32) {
    %c0_i32 = arith.constant 0 : i32
    %c0_i32_0 = arith.constant 0 : i32
    return %c0_i32, %arg0 : i32, i32
  }
}

</mosaic_0001>

<bundles_post_ra>
// kernel: tpu_custom_call.1
= control target key start
LH: loop header
LB: loop body
LE: loop exit
PB: predicated region body
PF: predicated region fallthrough
CT: control target
= control target key end

     0   :  { %7 = vsyncpa [#allocation3], 0  ;;  %s251_s0 = inlined_call_operand.hbm [shape: f32[1,128], index: 0, kind: input, shape index: {}]   ;;  %s252_s1 = inlined_call_operand.hbm [shape: f32[32,128], index: 1, kind: input, shape index: {}]   ;;  %s253_s2 = inlined_call_operand.hbm [shape: f32[1,32], index: 2, kind: output, shape index: {}]  }
   0x1   :  { %8 = vsyncpa [#allocation6], 0 }
   0x2   :  { %9 = vsyncpa [#allocation4], 0  ;;  %s220_s9 = smov [#allocation2]   ;;  %s221_s11 = smov [#allocation5]  }
   0x3   :  { %s16_s10 = sshll.u32 %s220_s9, 4  ;;  %s25_s12 = sshll.u32 %s221_s11, 4  ;;  %s17_s10 = int_to_ptr.vmem [resolvable:$true] %s16_s10  ;;  %s26_s12 = int_to_ptr.vmem [resolvable:$true] %s25_s12 }
   0x4   :  { %s162_s13 = scalar_lea.vmem %s17_s10, 16  ;;  %s166_s14 = scalar_lea.vmem %s17_s10, 32 }
   0x5   :  { %p163_p0 = scmp.ne.s32.totalorder %s17_s10, %s162_s13  ;;  %p167_p1 = scmp.lt.s32.totalorder %s17_s10, %s17_s10 }
   0x6   :  { %p168_p2 = scmp.lt.s32.totalorder %s166_s14, %s162_s13 }
   0x8   :  { %p169_p3 = por %p168_p2, %p167_p1 }
   0xa   :  { %p170_p4 = pnand %p169_p3, %p163_p0 }
   0xc   :  { %173 = shalt.err (!%p170_p4)
}
   0xd   :  { %19 = dma.hbm_to_vmem [thread:$0]  %s251_s0, 16, %s17_s10, [#allocation3]  }
   0xe   :  { %s182_s17 = scalar_lea.vmem %s26_s12, 512  ;;  %p187_p6 = scmp.lt.s32.totalorder %s26_s12, %s26_s12 }
   0xf   :  { %p183_p5 = scmp.ne.s32.totalorder %s26_s12, %s182_s17  ;;  %p188_p7 = scmp.lt.s32.totalorder %s182_s17, %s182_s17 }
  0x11   :  { %p189_p8 = por %p188_p7, %p187_p6 }
  0x13   :  { %p190_p9 = pnand %p189_p8, %p183_p5 }
  0x15   :  { %193 = shalt.err (!%p190_p9)
}
  0x16   :  { %s222_s18 = smov 128   ;;  %s223_s19 = smov 8  }
  0x17   :  { %31 = dma.hbm_to_vmem [thread:$0]  %s252_s1, 512, %s26_s12, [#allocation6], %s222_s18, %s222_s18, %s223_s19  }
  0x18   :  { %214 = dma.done.wait [#allocation3], 16  }
  0x19   :  { %215 = vsyncadd [#allocation3], 4294967280 }
  0x1a   :  { %216 = dma.done.wait [#allocation6], 512  }
  0x1b   :  { %217 = vsyncadd [#allocation6], 4294966784  ;;  %v224_v0 = vmov 0.0   ;;  %vm225_vm0 = vmmov 0   ;;  %v42_v1 = vld [vmem:[#allocation5 + $0x18] sm:$0xff]  ;;  %v41_v2 = vld [vmem:[#allocation5 + $0x10] sm:$0xff] }
  0x1c   :  { %136 = vmatprep.subr.mxu0 %v224_v0  ;;  %144 = vmatprep.mubr.msk.f32.mxu0 %vm225_vm0, %v224_v0  ;;  %v40_v3 = vld [vmem:[#allocation5 + $0x8] sm:$0xff]  ;;  %v39_v4 = vld [vmem:[#allocation5] sm:$0xff]  ;;  %v38_v5 = vld [vmem:[#allocation2] sm:$0x1]  ;;  %s226_s0 = smov [#allocation7]   ;;  %vm113_vm1 = vcmask 253952  }
  0x1d   :  { %137 = vmatpush3.xpose.msra.mxu0 %v42_v1  ;;  %s121_s1 = sshll.u32 %s226_s0, 4  ;;  %s122_s1 = int_to_ptr.vmem [resolvable:$true] %s121_s1 }
  0x1e   :  { %138 = vmatprep.subr.mxu0 %v224_v0  ;;  %s194_s22 = scalar_lea.vmem %s122_s1, 16  ;;  %s198_s23 = scalar_lea.vmem %s122_s1, 32 }
  0x1f   :  { %p195_p10 = scmp.ne.s32.totalorder %s122_s1, %s194_s22  ;;  %p199_p11 = scmp.lt.s32.totalorder %s122_s1, %s122_s1 }
  0x20   :  { %p200_p12 = scmp.lt.s32.totalorder %s198_s23, %s194_s22 }
  0x21   :  { %139 = vmatpush3.xpose.msra.mxu0 %v41_v2 }
  0x22   :  { %140 = vmatprep.subr.mxu0 %v224_v0  ;;  %p201_p13 = por %p200_p12, %p199_p11 }
  0x24   :  { %p202_p0 = pnand %p201_p13, %p195_p10 }
  0x25   :  { %141 = vmatpush3.xpose.msra.mxu0 %v40_v3 }
  0x26   :  { %142 = vmatprep.subr.mxu0 %v224_v0 }
  0x29   :  { %143 = vmatpush3.xpose.msra.mxu0 %v39_v4 }
  0x2c   :  { %145 = vmatmul.mubr.f32.vlgmr.msra.gmra.mxu0 %v38_v5 }
  0xec   :  { %v109_v6 = vpop.f32.mrf.mxu0 }
  0xed   :  { %114 = vst.msk [vmem:[#allocation7] sm:$0x1] %vm113_vm1, %v109_v6 }
  0xee   :  { %v146_v7 = vpop.f32.mrf.mxu0 }
  0xef   :  { %205 = shalt.err (!%p202_p0)
}
  0xf0   :  { %124 = dma.vmem_to_hbm [thread:$0]  %s122_s1, 16, %s253_s2, [#allocation4]  }
  0xf1   :  { %218 = dma.done.wait [#allocation4], 16  }
  0xf2   :  { %219 = vsyncadd [#allocation4], 4294967280 }
  0xf3   :  { %128 = vsyncpa [#allocation3], 1 }
  0xf4   :  { %129 = vsyncpa [#allocation6], 1 }
  0xf5   :  { %130 = vsyncpa [#allocation4], 1 }

</bundles_post_ra>
